<compile_context>
chip_gen: v7x
topology: tpu7x:2x2x1
jax: 0.10.0
libtpu: 0.0.40
codegen_flags: <defaults>
</compile_context>

<pallas_src>
import functools

import jax
import jax.numpy as jnp
from jax.experimental import pallas as pl
from jax.experimental.pallas import tpu as pltpu

IN_DIM = 8
HID_DIM = 128
OUT_DIM = 6
OUT_PAD = 8            # smallest legal last-dim (== full array dim); 16x fewer HBM bytes than 128
TILE_B_MAX = 4096      # rows per grid step


def _round_up(n, m):
    return ((n + m - 1) // m) * m


def mlp_kernel(x_ref, w1_ref, b1_ref, w2_ref, b2_ref, o_ref):
    """One (population, batch-tile) step. All blocks carry a leading size-1 pop axis."""
    # ---- Layer 1 on the MXU: bf16 inputs, f32 accumulation ----
    x = x_ref[0].astype(jnp.bfloat16)                                  # (tile_b, 8)
    h = jnp.dot(x, w1_ref[0], preferred_element_type=jnp.float32)     # (tile_b, 128)
    h = jnp.maximum(h + b1_ref[0], 0.0)                                # bias + ReLU, f32 VPU

    # ---- Layer 2 on the MXU: bf16 inputs, f32 accumulation ----
    o = jnp.dot(h.astype(jnp.bfloat16), w2_ref[0],
                preferred_element_type=jnp.float32)                    # (tile_b, 8)
    o_ref[0] = o + b2_ref[0]                                           # bias add in f32


def prepare_params(w1, b1, w2, b2):
    """One-time parameter prep (do this OUTSIDE the per-call jit).

    Accepts single-network params (w1 (8,128), b1 (1,128)/(128,), w2 (128,6),
    b2 (1,6)/(6,)) or population-stacked params with a leading P axis.
    Casts weights to bf16 and pads the output dim to OUT_PAD lanes.
    """
    w1 = jnp.asarray(w1, jnp.float32)
    b1 = jnp.asarray(b1, jnp.float32)
    w2 = jnp.asarray(w2, jnp.float32)
    b2 = jnp.asarray(b2, jnp.float32)
    if w1.ndim == 2:                       # single network -> add population axis
        w1, w2 = w1[None], w2[None]
        b1 = b1.reshape(1, 1, HID_DIM)
        b2 = b2.reshape(1, 1, OUT_DIM)
    P = w1.shape[0]
    b1 = b1.reshape(P, 1, HID_DIM)
    b2 = b2.reshape(P, 1, OUT_DIM)

    w1p = w1.astype(jnp.bfloat16)                                        # (P, 8, 128)
    w2p = jnp.zeros((P, HID_DIM, OUT_PAD), jnp.bfloat16)
    w2p = w2p.at[:, :, :OUT_DIM].set(w2.astype(jnp.bfloat16))            # (P, 128, 8)
    b2p = jnp.zeros((P, 1, OUT_PAD), jnp.float32).at[:, :, :OUT_DIM].set(b2)
    return {"w1": w1p, "b1": b1, "w2": w2p, "b2": b2p}


@functools.partial(jax.jit, static_argnames=("tile_b_max", "trim"))
def neural_network_forward(x, params, *, tile_b_max=TILE_B_MAX, trim=True):
    """relu(x @ W1 + b1) @ W2 + b2, optionally batched over a GA population.

    x: (B, 8) with single-network params, or (P, B, 8) with population params.
    Returns (B, 6) / (P, B, 6) if trim=True, else the padded (…, b_pad, 8)
    slab (slice [..., :OUT_DIM] at the consumption point to save a copy pass).
    """
    squeeze_pop = (x.ndim == 2)
    if squeeze_pop:
        x = x[None]
    P, B, _ = x.shape
    assert params["w1"].shape[0] == P, "population size mismatch"

    # --- batch tiling ---
    if B <= tile_b_max:
        if P == 1 and B > 8:
            # single net: make >=2 tiles so both v7x TensorCores get work
            tile_b = _round_up(pl.cdiv(B, 2), 8)
        else:
            tile_b = max(8, _round_up(B, 8))
    else:
        tile_b = tile_b_max
    b_pad = _round_up(B, tile_b)
    if b_pad != B:
        x = jnp.zeros((P, b_pad, IN_DIM), x.dtype).at[:, :B].set(x)

    grid = (P, b_pad // tile_b)

    cost = pl.CostEstimate(
        flops=2 * P * b_pad * (IN_DIM * HID_DIM + HID_DIM * OUT_PAD),
        transcendentals=0,
        bytes_accessed=P * (b_pad * IN_DIM * 4 + b_pad * OUT_PAD * 4
                            + IN_DIM * HID_DIM * 2 + HID_DIM * 4
                            + HID_DIM * OUT_PAD * 2 + OUT_PAD * 4),
    )

    out = pl.pallas_call(
        mlp_kernel,
        out_shape=jax.ShapeDtypeStruct((P, b_pad, OUT_PAD), jnp.float32),
        grid=grid,
        in_specs=[
            pl.BlockSpec((1, tile_b, IN_DIM), lambda p, i: (p, i, 0)),    # x: per-tile
            pl.BlockSpec((1, IN_DIM, HID_DIM), lambda p, i: (p, 0, 0)),   # W1: per-individual, resident
            pl.BlockSpec((1, 1, HID_DIM), lambda p, i: (p, 0, 0)),        # b1
            pl.BlockSpec((1, HID_DIM, OUT_PAD), lambda p, i: (p, 0, 0)),  # W2
            pl.BlockSpec((1, 1, OUT_PAD), lambda p, i: (p, 0, 0)),        # b2
        ],
        out_specs=pl.BlockSpec((1, tile_b, OUT_PAD), lambda p, i: (p, i, 0)),
        compiler_params=pltpu.CompilerParams(
            dimension_semantics=("parallel", "parallel")),
        cost_estimate=cost,
    )(x, params["w1"], params["b1"], params["w2"], params["b2"])

    if trim:
        out = out[:, :B, :OUT_DIM]
    if squeeze_pop:
        out = out[0]
    return out


def init_params(key):
    """Deterministic init mimicking torch.nn.Linear default (U[-1/sqrt(fan_in), +])."""
    k1, k2, k3, k4 = jax.random.split(key, 4)
    bound1 = 1.0 / jnp.sqrt(IN_DIM)
    bound2 = 1.0 / jnp.sqrt(HID_DIM)
    w1 = jax.random.uniform(k1, (IN_DIM, HID_DIM), jnp.float32, -bound1, bound1)
    b1 = jax.random.uniform(k2, (1, HID_DIM), jnp.float32, -bound1, bound1)
    w2 = jax.random.uniform(k3, (HID_DIM, OUT_DIM), jnp.float32, -bound2, bound2)
    b2 = jax.random.uniform(k4, (1, OUT_DIM), jnp.float32, -bound2, bound2)
    return w1, b1, w2, b2


def init_population(key, pop):
    """Stacked GA population params: leading P axis."""
    k1, k2, k3, k4 = jax.random.split(key, 4)
    bound1 = 1.0 / jnp.sqrt(IN_DIM)
    bound2 = 1.0 / jnp.sqrt(HID_DIM)
    w1 = jax.random.uniform(k1, (pop, IN_DIM, HID_DIM), jnp.float32, -bound1, bound1)
    b1 = jax.random.uniform(k2, (pop, 1, HID_DIM), jnp.float32, -bound1, bound1)
    w2 = jax.random.uniform(k3, (pop, HID_DIM, OUT_DIM), jnp.float32, -bound2, bound2)
    b2 = jax.random.uniform(k4, (pop, 1, OUT_DIM), jnp.float32, -bound2, bound2)
    return w1, b1, w2, b2


def _reference_bf16(x, w1, b1, w2, b2):
    """Plain-JAX reference with the same numerics as the kernel (bf16 matmuls, f32 acc)."""
    h = jnp.dot(x.astype(jnp.bfloat16), w1.astype(jnp.bfloat16),
                preferred_element_type=jnp.float32)
    h = jnp.maximum(h + b1, 0.0)
    o = jnp.dot(h.astype(jnp.bfloat16), w2.astype(jnp.bfloat16),
                preferred_element_type=jnp.float32)
    return o + b2


if __name__ == "__main__":
    key = jax.random.PRNGKey(0)
    kx, kp, kx2, kpop, kx3 = jax.random.split(key, 5)
    w1, b1, w2, b2 = init_params(kp)
    params = prepare_params(w1, b1, w2, b2)           # one-time prep, outside the jit

    # Small batch (GA-style evaluation of a handful of observations).
    B = 8
    x = jax.random.normal(kx, (B, IN_DIM), jnp.float32)
    logits = jax.block_until_ready(neural_network_forward(x, params))
    assert logits.shape == (B, OUT_DIM)
    ref_bf16 = _reference_bf16(x, w1, b1, w2, b2)
    ref_f32 = jnp.maximum(x @ w1 + b1, 0.0) @ w2 + b2
    assert jnp.allclose(logits, ref_bf16, atol=5e-3, rtol=5e-3)
    assert jnp.allclose(logits, ref_f32, atol=5e-2, rtol=5e-2)

    # Larger batch to exercise the multi-tile grid / resident-weights path.
    B2 = 2048
    x2 = jax.random.normal(kx2, (B2, IN_DIM), jnp.float32)
    logits2 = jax.block_until_ready(
        neural_network_forward(x2, params, tile_b_max=512))
    assert logits2.shape == (B2, OUT_DIM)
    assert jnp.allclose(logits2, _reference_bf16(x2, w1, b1, w2, b2),
                        atol=5e-3, rtol=5e-3)

    # Population-batched evaluation: one pallas_call for the whole GA population.
    P, B3 = 4, 16
    pw1, pb1, pw2, pb2 = init_population(kpop, P)
    pop_params = prepare_params(pw1, pb1, pw2, pb2)
    x3 = jax.random.normal(kx3, (P, B3, IN_DIM), jnp.float32)
    logits3 = jax.block_until_ready(neural_network_forward(x3, pop_params))
    assert logits3.shape == (P, B3, OUT_DIM)
    ref3 = jax.vmap(_reference_bf16)(x3, pw1, pb1, pw2, pb2)
    assert jnp.allclose(logits3, ref3, atol=5e-3, rtol=5e-3)

    # TODO(synk): NeuralNetwork.predict's softmax + np.random.choice sampling is
    # host-side glue (per-row categorical draw), intentionally left outside the kernel.
    print("KERNEL_OK")
</pallas_src>

<mosaic_0001>
module attributes {stable_mosaic.version = 11 : i64} {
  func.func @mlp_kernel(%arg0: i32, %arg1: i32, %arg2: memref<1x8x8xf32, #tpu.memory_space<vmem>>, %arg3: memref<1x8x128xbf16, #tpu.memory_space<vmem>>, %arg4: memref<1x1x128xf32, #tpu.memory_space<vmem>>, %arg5: memref<1x128x8xbf16, #tpu.memory_space<vmem>>, %arg6: memref<1x1x8xf32, #tpu.memory_space<vmem>>, %arg7: memref<1x8x8xf32, #tpu.memory_space<vmem>>) attributes {dimension_semantics = [#tpu.dimension_semantics<parallel>, #tpu.dimension_semantics<parallel>], iteration_bounds = array<i64: 1, 1>, scalar_prefetch = 0 : i64, scratch_operands = 0 : i64, tpu.core_type = #tpu.core_type<tc>, window_params = [{transform_indices = @transform_0, window_bounds = array<i64: 1, 8, 8>}, {transform_indices = @transform_1, window_bounds = array<i64: 1, 8, 128>}, {transform_indices = @transform_2, window_bounds = array<i64: 1, 1, 128>}, {transform_indices = @transform_3, window_bounds = array<i64: 1, 128, 8>}, {transform_indices = @transform_4, window_bounds = array<i64: 1, 1, 8>}, {transform_indices = @transform_5, window_bounds = array<i64: 1, 8, 8>}]} {
    %c0 = arith.constant 0 : index
    %c0_0 = arith.constant 0 : index
    %c0_1 = arith.constant 0 : index
    %0 = vector.load %arg2[%c0, %c0_0, %c0_1] : memref<1x8x8xf32, #tpu.memory_space<vmem>>, vector<1x8x8xf32>
    %1 = vector.shape_cast %0 : vector<1x8x8xf32> to vector<8x8xf32>
    %2 = arith.truncf %1 : vector<8x8xf32> to vector<8x8xbf16>
    %c0_2 = arith.constant 0 : index
    %c0_3 = arith.constant 0 : index
    %c0_4 = arith.constant 0 : index
    %3 = vector.load %arg3[%c0_2, %c0_3, %c0_4] : memref<1x8x128xbf16, #tpu.memory_space<vmem>>, vector<1x8x128xbf16>
    %4 = vector.shape_cast %3 : vector<1x8x128xbf16> to vector<8x128xbf16>
    %cst = arith.constant dense<0.000000e+00> : vector<8x128xf32>
    %5 = tpu.matmul %2, %4, %cst {dimension_numbers = #tpu.dot_dimension_numbers<[1], [0], [0], [1], [0, 0, 1, 1], [], []>} : vector<8x8xbf16>, vector<8x128xbf16>, vector<8x128xf32> -> vector<8x128xf32>
    %c0_5 = arith.constant 0 : index
    %c0_6 = arith.constant 0 : index
    %c0_7 = arith.constant 0 : index
    %6 = vector.load %arg4[%c0_5, %c0_6, %c0_7] : memref<1x1x128xf32, #tpu.memory_space<vmem>>, vector<1x1x128xf32>
    %7 = vector.shape_cast %6 : vector<1x1x128xf32> to vector<1x128xf32>
    %8 = vector.broadcast %7 : vector<1x128xf32> to vector<8x128xf32>
    %9 = arith.addf %5, %8 : vector<8x128xf32>
    %cst_8 = arith.constant 0.000000e+00 : f32
    %10 = vector.broadcast %cst_8 : f32 to vector<8x128xf32>
    %11 = arith.maximumf %9, %10 : vector<8x128xf32>
    %12 = arith.truncf %11 : vector<8x128xf32> to vector<8x128xbf16>
    %c0_9 = arith.constant 0 : index
    %c0_10 = arith.constant 0 : index
    %c0_11 = arith.constant 0 : index
    %13 = vector.load %arg5[%c0_9, %c0_10, %c0_11] : memref<1x128x8xbf16, #tpu.memory_space<vmem>>, vector<1x128x8xbf16>
    %14 = vector.shape_cast %13 : vector<1x128x8xbf16> to vector<128x8xbf16>
    %cst_12 = arith.constant dense<0.000000e+00> : vector<8x8xf32>
    %15 = tpu.matmul %12, %14, %cst_12 {dimension_numbers = #tpu.dot_dimension_numbers<[1], [0], [0], [1], [0, 0, 1, 1], [], []>} : vector<8x128xbf16>, vector<128x8xbf16>, vector<8x8xf32> -> vector<8x8xf32>
    %c0_13 = arith.constant 0 : index
    %c0_14 = arith.constant 0 : index
    %c0_15 = arith.constant 0 : index
    %16 = vector.load %arg6[%c0_13, %c0_14, %c0_15] : memref<1x1x8xf32, #tpu.memory_space<vmem>>, vector<1x1x8xf32>
    %17 = vector.shape_cast %16 : vector<1x1x8xf32> to vector<1x8xf32>
    %18 = vector.broadcast %17 : vector<1x8xf32> to vector<8x8xf32>
    %19 = arith.addf %15, %18 : vector<8x8xf32>
    %c0_16 = arith.constant 0 : index
    %c0_17 = arith.constant 0 : index
    %c0_18 = arith.constant 0 : index
    %20 = vector.load %arg7[%c0_16, %c0_17, %c0_18] : memref<1x8x8xf32, #tpu.memory_space<vmem>>, vector<1x8x8xf32>
    %21 = vector.shape_cast %20 : vector<1x8x8xf32> to vector<8x8xf32>
    %22 = vector.shape_cast %19 : vector<8x8xf32> to vector<1x8x8xf32>
    tpu.vector_store %arg7[%c0_16, %c0_17, %c0_18], %22 {strides = array<i32>} : memref<1x8x8xf32, #tpu.memory_space<vmem>>, vector<1x8x8xf32>,
    return
  }
  func.func @transform_0(%arg0: i32, %arg1: i32) -> (i32, i32, i32) {
    %c0_i32 = arith.constant 0 : i32
    %c0_i32_0 = arith.constant 0 : i32
    return %arg0, %arg1, %c0_i32 : i32, i32, i32
  }
  func.func @transform_1(%arg0: i32, %arg1: i32) -> (i32, i32, i32) {
    %c0_i32 = arith.constant 0 : i32
    %c0_i32_0 = arith.constant 0 : i32
    %c0_i32_1 = arith.constant 0 : i32
    return %arg0, %c0_i32, %c0_i32_0 : i32, i32, i32
  }
  func.func @transform_2(%arg0: i32, %arg1: i32) -> (i32, i32, i32) {
    %c0_i32 = arith.constant 0 : i32
    %c0_i32_0 = arith.constant 0 : i32
    %c0_i32_1 = arith.constant 0 : i32
    return %arg0, %c0_i32, %c0_i32_0 : i32, i32, i32
  }
  func.func @transform_3(%arg0: i32, %arg1: i32) -> (i32, i32, i32) {
    %c0_i32 = arith.constant 0 : i32
    %c0_i32_0 = arith.constant 0 : i32
    %c0_i32_1 = arith.constant 0 : i32
    return %arg0, %c0_i32, %c0_i32_0 : i32, i32, i32
  }
  func.func @transform_4(%arg0: i32, %arg1: i32) -> (i32, i32, i32) {
    %c0_i32 = arith.constant 0 : i32
    %c0_i32_0 = arith.constant 0 : i32
    %c0_i32_1 = arith.constant 0 : i32
    return %arg0, %c0_i32, %c0_i32_0 : i32, i32, i32
  }
  func.func @transform_5(%arg0: i32, %arg1: i32) -> (i32, i32, i32) {
    %c0_i32 = arith.constant 0 : i32
    %c0_i32_0 = arith.constant 0 : i32
    return %arg0, %arg1, %c0_i32 : i32, i32, i32
  }
}

</mosaic_0001>

<bundles_post_ra>
// kernel: neural_network_forward.1
= control target key start
LH: loop header
LB: loop body
LE: loop exit
PB: predicated region body
PF: predicated region fallthrough
CT: control target
= control target key end

     0   :  { %vm35_vm0 = vcmask 1043456   ;;  %v255_v0 = vmov 0.0   ;;  %vm256_vm1 = vmmov 0   ;;  %vm31_vm2 = vcmask 64512   ;;  %s328_s1 = inlined_call_operand.vmem [shape: bf16[1,8,128], index: 1, kind: input, shape index: {}]   ;;  %s329_s0 = inlined_call_operand.vmem [shape: f32[1,8,8], index: 0, kind: input, shape index: {}]   ;;  %s330_s3 = inlined_call_operand.vmem [shape: bf16[1,128,8], index: 3, kind: input, shape index: {}]   ;;  %s331_s2 = inlined_call_operand.vmem [shape: f32[1,1,128], index: 2, kind: input, shape index: {}]   ;;  %s332_s4 = inlined_call_operand.vmem [shape: f32[1,1,8], index: 4, kind: input, shape index: {}]   ;;  %s333_s5 = inlined_call_operand.vmem [shape: f32[1,8,8], index: 5, kind: output, shape index: {}]  }
   0x1   :  { %219 = vmatprep.subr.bf16.mxu0 %v255_v0  ;;  %v23_v1 = vld [vmem:[%s328_s1] sm:$0xf]  ;;  %221 = vmatprep.mubr.msk.bf16.mxu0 %vm256_vm1, %v255_v0  ;;  %v248_v6 = vld [vmem:[%s330_s3 + $0x8] sm:$0xff]   ;;  %v249_v7 = vld [vmem:[%s330_s3 + $0x10] sm:$0xff]  }
   0x2   :  { %v21_v2 = vld [vmem:[%s329_s0] sm:$0xff]  ;;  %v37_v3 = vsel %vm35_vm0, %v23_v1, 0  ;;  %225 = vmatprep.subr.bf16.mxu1 %v255_v0  ;;  %241 = vmatprep.mubr.msk.bf16.mxu1 %vm256_vm1, %v255_v0  ;;  %v250_v8 = vld [vmem:[%s330_s3 + $0x18] sm:$0xff]   ;;  %v252_v10 = vld [vmem:[%s330_s3 + $0x28] sm:$0xff]  }
   0x3   :  { %v22_v4 = vpack.c.bf16 %v21_v2, %v21_v2  ;;  %v247_v5 = vld [vmem:[%s330_s3] sm:$0xff]   ;;  %220 = vmatpush3.bf16.msra.mxu0 %v37_v3  ;;  %v253_v11 = vld [vmem:[%s330_s3 + $0x30] sm:$0xff]   ;;  %v254_v12 = vld [vmem:[%s330_s3 + $0x38] sm:$0xff]  }
   0x4   :  { %226 = vmatpush3.bf16.msra.mxu1 %v247_v5  ;;  %v251_v9 = vld [vmem:[%s330_s3 + $0x20] sm:$0xff]  }
   0x5   :  { %227 = vmatprep.subr.bf16.mxu1 %v255_v0  ;;  %v197_v13 = vld [vmem:[%s331_s2] ss:$0 sm:$0xff] }
   0x6   :  { %222 = vmatmul.mubr.msk.bf16.vlgmr.msra.gmra.mrb[0].mxu0 %vm31_vm2, %v22_v4  ;;  %v199_v21 = vld [vmem:[%s332_s4] ss:$0 sm:$0xff] }
   0x8   :  { %228 = vmatpush3.bf16.msra.mxu1 %v248_v6 }
   0x9   :  { %229 = vmatprep.subr.bf16.mxu1 %v255_v0 }
   0xc   :  { %230 = vmatpush3.bf16.msra.mxu1 %v249_v7 }
   0xd   :  { %231 = vmatprep.subr.bf16.mxu1 %v255_v0 }
  0x10   :  { %232 = vmatpush3.bf16.msra.mxu1 %v250_v8 }
  0x11   :  { %233 = vmatprep.subr.bf16.mxu1 %v255_v0 }
  0x14   :  { %234 = vmatpush3.bf16.msra.mxu1 %v251_v9 }
  0x15   :  { %235 = vmatprep.subr.bf16.mxu1 %v255_v0 }
  0x18   :  { %236 = vmatpush3.bf16.msra.mxu1 %v252_v10 }
  0x19   :  { %237 = vmatprep.subr.bf16.mxu1 %v255_v0 }
  0x1c   :  { %238 = vmatpush3.bf16.msra.mxu1 %v253_v11 }
  0x1d   :  { %239 = vmatprep.subr.bf16.mxu1 %v255_v0 }
  0x20   :  { %240 = vmatpush3.bf16.msra.mxu1 %v254_v12 }
  0xd9   :  { %v73_v14 = vpop.f32.mrb[0].mxu0 }
  0xda   :  { %v74_v15 = vadd.f32 %v197_v13, %v73_v14  ;;  %v223_v16 = vpop.f32.mrb[1].mxu0 }
  0xdb   :  { %v76_v17 = vpop.f32.mrb[2].mxu0 }
  0xdc   :  { %v79_v18 = vmax.f32 %v74_v15, 0.0  ;;  %v224_v19 = vpop.f32.mrb[3].mxu0 }
  0xde   :  { %v80_v20 = vpack.c.bf16 %v79_v18, %v79_v18 }
  0xe0   :  { %242 = vmatmul.mubr.bf16.vlgmr.msra.gmra.mrb[0].mxu1 %v80_v20 }
 0x1b3   :  { %v186_v22 = vpop.f32.mrb[0].mxu1 }
 0x1b4   :  { %v187_v23 = vadd.f32 %v199_v21, %v186_v22  ;;  %v243_v24 = vpop.f32.mrb[1].mxu1 }
 0x1b5   :  { %v189_v25 = vpop.f32.mrb[2].mxu1 }
 0x1b6   :  { %192 = vst.msk [vmem:[%s333_s5] sm:$0xff] %vm31_vm2, %v187_v23  ;;  %v244_v26 = vpop.f32.mrb[3].mxu1 }

</bundles_post_ra>
